<compile_context>
chip_gen: v7x
topology: tpu7x:2x2x1
jax: 0.10.0
libtpu: 0.0.40
codegen_flags: <defaults>
</compile_context>

<pallas_src>
import functools
from typing import NamedTuple

import jax
import jax.numpy as jnp
from jax.experimental import pallas as pl
from jax.experimental.pallas import tpu as pltpu


def _round_up(x: int, m: int) -> int:
    return ((x + m - 1) // m) * m


class BayesLinearParams(NamedTuple):
    wmu: jax.Array    # (K, N) bf16  -- weight_mu, transposed to (in, out), padded
    wsig: jax.Array   # (K, N) bf16  -- exp(weight_logsigma), transposed, padded
    bmu: jax.Array    # (1, N) f32   -- bias_mu, padded
    bsig: jax.Array   # (1, N) f32   -- exp(bias_logsigma), padded (0 in pad region)


def prepare_bayesian_linear(weight_mu, weight_logsigma, bias_mu, bias_logsigma,
                            *, tn: int = 512, tk: int = 512):
    """One-time (per parameter update) preparation.

    Transposes the weights to MXU-native (K, N) layout, precomputes
    sigma = exp(logsigma), casts the big streams to bf16 and pads everything to
    tile multiples.  Returns (params, meta) where meta is a static tuple
    (in_features, out_features, K, N, tk, tn) passed to the forward.
    """
    out_features, in_features = weight_mu.shape
    tn = min(tn, _round_up(out_features, 128))
    tk = min(tk, _round_up(in_features, 128))
    N = _round_up(out_features, tn)
    K = _round_up(in_features, tk)

    bf16, f32 = jnp.bfloat16, jnp.float32
    pad_w = ((0, K - in_features), (0, N - out_features))
    pad_b = ((0, 0), (0, N - out_features))

    # sigma (not logsigma) is streamed -> no exp in the kernel.  Zero padding of
    # sigma guarantees the padded weight entries are exactly 0.
    wmu = jnp.pad(weight_mu.astype(f32).T.astype(bf16), pad_w)
    wsig = jnp.pad(jnp.exp(weight_logsigma.astype(f32)).T.astype(bf16), pad_w)
    bmu = jnp.pad(bias_mu.astype(f32).reshape(1, -1), pad_b)
    bsig = jnp.pad(jnp.exp(bias_logsigma.astype(f32)).reshape(1, -1), pad_b)

    params = BayesLinearParams(wmu=wmu, wsig=wsig, bmu=bmu, bsig=bsig)
    meta = (in_features, out_features, K, N, tk, tn)
    return params, meta


def _bayes_linear_kernel(x_ref,              # (tm, tk) bf16
                         wmu_ref, wsig_ref,  # (tk, tn) bf16  -- (K, N) layout
                         eps_ref,            # (tk, tn) bf16
                         bias_ref,           # (1,  tn) f32   -- already sampled
                         o_ref,              # (tm, tn) f32
                         acc_ref):           # (tm, tn) f32 scratch accumulator
    k = pl.program_id(2)                     # K tile index (reduction axis)

    @pl.when(k == 0)
    def _init():
        # Fold the (already sampled) bias into the accumulator init.
        acc_ref[...] = jnp.broadcast_to(bias_ref[...], acc_ref.shape)

    # Compose the sampled weight tile in bf16 on the VPU, feed the MXU's native
    # bf16 path, accumulate in f32.
    w = wmu_ref[...] + wsig_ref[...] * eps_ref[...]
    acc_ref[...] += jnp.dot(x_ref[...], w, preferred_element_type=jnp.float32)

    @pl.when(k == pl.num_programs(2) - 1)
    def _finalize():
        o_ref[...] = acc_ref[...].astype(o_ref.dtype)


@functools.partial(jax.jit, static_argnames=("meta", "tm"))
def bayesian_linear_forward(params: BayesLinearParams, x, key, *, meta, tm: int = 512):
    """Forward pass; one fresh weight/bias sample per call, seeded by `key`."""
    in_features, out_features, K, N, tk, tn = meta
    assert x.shape[1] == in_features
    batch = x.shape[0]
    f32, bf16 = jnp.float32, jnp.bfloat16

    tm = min(tm, _round_up(batch, 8))
    M = _round_up(batch, tm)

    # v7x has 2 TensorCores and shards the "parallel" grid axes across them;
    # make sure the parallel sub-grid has >= 2 blocks when tn allows it.
    if M // tm == 1 and N // tn == 1 and tn % 256 == 0:
        tn = tn // 2

    kw, kb = jax.random.split(key)
    # Grid-/tile-invariant draws at the logical shape; zero-padded so the
    # padded weight entries stay exactly 0 (sigma is also 0 there).
    eps_w = jnp.pad(
        jax.random.normal(kw, (in_features, out_features), f32).astype(bf16),
        ((0, K - in_features), (0, N - out_features)))
    eps_b = jnp.pad(jax.random.normal(kb, (out_features,), f32).reshape(1, -1),
                    ((0, 0), (0, N - out_features)))
    # Bias compose is O(N): do it in f32 here, kernel folds it into the acc.
    bias = params.bmu + params.bsig * eps_b

    xp = jnp.pad(x.astype(bf16), ((0, M - batch), (0, K - in_features)))

    grid = (M // tm, N // tn, K // tk)

    out = pl.pallas_call(
        _bayes_linear_kernel,
        out_shape=jax.ShapeDtypeStruct((M, N), f32),
        grid_spec=pltpu.PrefetchScalarGridSpec(
            num_scalar_prefetch=0,
            grid=grid,
            in_specs=[
                pl.BlockSpec((tm, tk), lambda i, j, k: (i, k)),   # x          bf16
                pl.BlockSpec((tk, tn), lambda i, j, k: (k, j)),   # weight_mu  bf16 (K,N)
                pl.BlockSpec((tk, tn), lambda i, j, k: (k, j)),   # weight_sig bf16 (K,N)
                pl.BlockSpec((tk, tn), lambda i, j, k: (k, j)),   # eps_w      bf16 (K,N)
                pl.BlockSpec((1, tn), lambda i, j, k: (0, j)),    # sampled bias f32
            ],
            out_specs=pl.BlockSpec((tm, tn), lambda i, j, k: (i, j)),
            scratch_shapes=[pltpu.VMEM((tm, tn), jnp.float32)],
        ),
        compiler_params=pltpu.CompilerParams(
            dimension_semantics=("parallel", "parallel", "arbitrary"),
            vmem_limit_bytes=32 * 1024 * 1024,
        ),
    )(xp, params.wmu, params.wsig, eps_w, bias)

    return out[:batch, :out_features]


if __name__ == "__main__":
    batch, in_features, out_features = 8, 256, 256

    root = jax.random.PRNGKey(0)
    k_x, k_wmu, k_bmu, k_n1, k_n2, k_x2, k_w2, k_b2 = jax.random.split(root, 8)

    # Parameter init mirroring the PyTorch __init__.
    weight_mu = 0.01 * jax.random.normal(k_wmu, (out_features, in_features), jnp.float32)
    weight_logsigma = jnp.full((out_features, in_features), -5.0, jnp.float32)
    bias_mu = 0.01 * jax.random.normal(k_bmu, (out_features,), jnp.float32)
    bias_logsigma = jnp.full((out_features,), -5.0, jnp.float32)
    x = jax.random.normal(k_x, (batch, in_features), jnp.float32)

    # bf16-rounded reference (the kernel intentionally runs the MXU bf16 path).
    bf = lambda a: a.astype(jnp.bfloat16).astype(jnp.float32)
    tiny = -40.0  # sigma ~ 4e-18 -> effectively deterministic

    # --- Check 1: near-zero noise must match the deterministic linear layer.
    #     Small tiles so the demo exercises a real (M, N, K) grid.
    p0, meta0 = prepare_bayesian_linear(
        weight_mu, jnp.full_like(weight_logsigma, tiny),
        bias_mu, jnp.full_like(bias_logsigma, tiny), tn=128, tk=128)
    y0 = jax.block_until_ready(bayesian_linear_forward(p0, x, k_n1, meta=meta0, tm=128))
    y_mean = bf(x) @ bf(weight_mu).T + bias_mu
    assert y0.shape == (batch, out_features)
    assert jnp.allclose(y0, y_mean, atol=2e-4, rtol=1e-4), \
        float(jnp.max(jnp.abs(y0 - y_mean)))

    # --- Check 2: wrapper padding path on unaligned shapes, noiseless reference.
    b2, i2, o2 = 5, 200, 100
    wmu2 = 0.01 * jax.random.normal(k_w2, (o2, i2), jnp.float32)
    bmu2 = 0.01 * jax.random.normal(k_b2, (o2,), jnp.float32)
    x2 = jax.random.normal(k_x2, (b2, i2), jnp.float32)
    p2, meta2 = prepare_bayesian_linear(wmu2, jnp.full((o2, i2), tiny),
                                        bmu2, jnp.full((o2,), tiny), tn=128, tk=128)
    y2 = jax.block_until_ready(bayesian_linear_forward(p2, x2, k_n1, meta=meta2, tm=128))
    assert y2.shape == (b2, o2)
    assert jnp.allclose(y2, bf(x2) @ bf(wmu2).T + bmu2, atol=2e-4, rtol=1e-4)

    # --- Check 3: stochastic path (logsigma = -5): deterministic per key,
    #              different across keys, deviation from the mean is O(sigma*||x||).
    p1, meta1 = prepare_bayesian_linear(weight_mu, weight_logsigma,
                                        bias_mu, bias_logsigma, tn=128, tk=128)
    run = functools.partial(bayesian_linear_forward, p1, meta=meta1, tm=128)
    ya = jax.block_until_ready(run(x, k_n1))
    yb = jax.block_until_ready(run(x, k_n1))
    yc = jax.block_until_ready(run(x, k_n2))
    assert jnp.array_equal(ya, yb)                      # same key  -> same sample
    assert float(jnp.max(jnp.abs(ya - yc))) > 1e-4      # new key   -> new sample
    dev = float(jnp.max(jnp.abs(ya - y_mean)))          # noise scale sanity
    assert 1e-3 < dev < 1.5, dev

    print("KERNEL_OK")
</pallas_src>

<mosaic_0001>
module attributes {stable_mosaic.version = 11 : i64} {
  func.func @_bayes_linear_kernel(%arg0: i32, %arg1: i32, %arg2: i32, %arg3: memref<8x128xbf16, #tpu.memory_space<vmem>>, %arg4: memref<128x128xbf16, #tpu.memory_space<vmem>>, %arg5: memref<128x128xbf16, #tpu.memory_space<vmem>>, %arg6: memref<128x128xbf16, #tpu.memory_space<vmem>>, %arg7: memref<1x128xf32, #tpu.memory_space<vmem>>, %arg8: memref<8x128xf32, #tpu.memory_space<vmem>>, %arg9: memref<8x128xf32, #tpu.memory_space<vmem>>) attributes {dimension_semantics = [#tpu.dimension_semantics<parallel>, #tpu.dimension_semantics<parallel>, #tpu.dimension_semantics<arbitrary>], iteration_bounds = array<i64: 1, 2, 2>, scalar_prefetch = 0 : i64, scratch_operands = 1 : i64, tpu.core_type = #tpu.core_type<tc>, window_params = [{transform_indices = @transform_0, window_bounds = array<i64: 8, 128>}, {transform_indices = @transform_1, window_bounds = array<i64: 128, 128>}, {transform_indices = @transform_2, window_bounds = array<i64: 128, 128>}, {transform_indices = @transform_3, window_bounds = array<i64: 128, 128>}, {transform_indices = @transform_4, window_bounds = array<i64: 1, 128>}, {transform_indices = @transform_5, window_bounds = array<i64: 8, 128>}]} {
    %c0_i32 = arith.constant 0 : i32
    %0 = arith.cmpi eq, %arg2, %c0_i32 : i32
    %1 = arith.extui %0 : i1 to i32
    %c0_i32_0 = arith.constant 0 : i32
    %2 = arith.cmpi ne, %1, %c0_i32_0 : i32
    scf.if %2 {
      %c0_13 = arith.constant 0 : index
      %c0_14 = arith.constant 0 : index
      %16 = vector.load %arg7[%c0_13, %c0_14] : memref<1x128xf32, #tpu.memory_space<vmem>>, vector<1x128xf32>
      %17 = vector.shape_cast %16 : vector<1x128xf32> to vector<1x128xf32>
      %18 = vector.broadcast %17 : vector<1x128xf32> to vector<8x128xf32>
      %c0_15 = arith.constant 0 : index
      %c0_16 = arith.constant 0 : index
      %19 = vector.load %arg9[%c0_15, %c0_16] : memref<8x128xf32, #tpu.memory_space<vmem>>, vector<8x128xf32>
      tpu.vector_store %arg9[%c0_15, %c0_16], %18 {strides = array<i32>} : memref<8x128xf32, #tpu.memory_space<vmem>>, vector<8x128xf32>,
    } else {
    }
    %c0 = arith.constant 0 : index
    %c0_1 = arith.constant 0 : index
    %3 = vector.load %arg4[%c0, %c0_1] : memref<128x128xbf16, #tpu.memory_space<vmem>>, vector<128x128xbf16>
    %c0_2 = arith.constant 0 : index
    %c0_3 = arith.constant 0 : index
    %4 = vector.load %arg5[%c0_2, %c0_3] : memref<128x128xbf16, #tpu.memory_space<vmem>>, vector<128x128xbf16>
    %c0_4 = arith.constant 0 : index
    %c0_5 = arith.constant 0 : index
    %5 = vector.load %arg6[%c0_4, %c0_5] : memref<128x128xbf16, #tpu.memory_space<vmem>>, vector<128x128xbf16>
    %6 = arith.mulf %4, %5 : vector<128x128xbf16>
    %7 = arith.addf %3, %6 : vector<128x128xbf16>
    %c0_6 = arith.constant 0 : index
    %c0_7 = arith.constant 0 : index
    %8 = vector.load %arg9[%c0_6, %c0_7] : memref<8x128xf32, #tpu.memory_space<vmem>>, vector<8x128xf32>
    %c0_8 = arith.constant 0 : index
    %c0_9 = arith.constant 0 : index
    %9 = vector.load %arg3[%c0_8, %c0_9] : memref<8x128xbf16, #tpu.memory_space<vmem>>, vector<8x128xbf16>
    %cst = arith.constant dense<0.000000e+00> : vector<8x128xf32>
    %10 = tpu.matmul %9, %7, %cst {dimension_numbers = #tpu.dot_dimension_numbers<[1], [0], [0], [1], [0, 0, 1, 1], [], []>} : vector<8x128xbf16>, vector<128x128xbf16>, vector<8x128xf32> -> vector<8x128xf32>
    %11 = arith.addf %8, %10 : vector<8x128xf32>
    %c0_10 = arith.constant 0 : index
    %c0_11 = arith.constant 0 : index
    %12 = vector.load %arg9[%c0_10, %c0_11] : memref<8x128xf32, #tpu.memory_space<vmem>>, vector<8x128xf32>
    tpu.vector_store %arg9[%c0_10, %c0_11], %11 {strides = array<i32>} : memref<8x128xf32, #tpu.memory_space<vmem>>, vector<8x128xf32>,
    %c1_i32 = arith.constant 1 : i32
    %13 = arith.cmpi eq, %arg2, %c1_i32 : i32
    %14 = arith.extui %13 : i1 to i32
    %c0_i32_12 = arith.constant 0 : i32
    %15 = arith.cmpi ne, %14, %c0_i32_12 : i32
    scf.if %15 {
      %c0_13 = arith.constant 0 : index
      %c0_14 = arith.constant 0 : index
      %16 = vector.load %arg9[%c0_13, %c0_14] : memref<8x128xf32, #tpu.memory_space<vmem>>, vector<8x128xf32>
      %c0_15 = arith.constant 0 : index
      %c0_16 = arith.constant 0 : index
      %17 = vector.load %arg8[%c0_15, %c0_16] : memref<8x128xf32, #tpu.memory_space<vmem>>, vector<8x128xf32>
      tpu.vector_store %arg8[%c0_15, %c0_16], %16 {strides = array<i32>} : memref<8x128xf32, #tpu.memory_space<vmem>>, vector<8x128xf32>,
    } else {
    }
    return
  }
  func.func @transform_0(%arg0: i32, %arg1: i32, %arg2: i32) -> (i32, i32) {
    %c0_i32 = arith.constant 0 : i32
    return %arg0, %arg2 : i32, i32
  }
  func.func @transform_1(%arg0: i32, %arg1: i32, %arg2: i32) -> (i32, i32) {
    %c0_i32 = arith.constant 0 : i32
    return %arg2, %arg1 : i32, i32
  }
  func.func @transform_2(%arg0: i32, %arg1: i32, %arg2: i32) -> (i32, i32) {
    %c0_i32 = arith.constant 0 : i32
    return %arg2, %arg1 : i32, i32
  }
  func.func @transform_3(%arg0: i32, %arg1: i32, %arg2: i32) -> (i32, i32) {
    %c0_i32 = arith.constant 0 : i32
    return %arg2, %arg1 : i32, i32
  }
  func.func @transform_4(%arg0: i32, %arg1: i32, %arg2: i32) -> (i32, i32) {
    %c0_i32 = arith.constant 0 : i32
    %c0_i32_0 = arith.constant 0 : i32
    return %c0_i32, %arg1 : i32, i32
  }
  func.func @transform_5(%arg0: i32, %arg1: i32, %arg2: i32) -> (i32, i32) {
    %c0_i32 = arith.constant 0 : i32
    return %arg0, %arg1 : i32, i32
  }
}

</mosaic_0001>

<bundles_post_ra>
// kernel: bayesian_linear_forward.3
= control target key start
LH: loop header
LB: loop body
LE: loop exit
PB: predicated region body
PF: predicated region fallthrough
CT: control target
= control target key end

     0   :  { %s1629_s0 = inlined_call_operand.vmem [shape: bf16[8,256], index: 0, kind: input, shape index: {}]   ;;  %s1630_s1 = inlined_call_operand.vmem [shape: bf16[256,256], index: 1, kind: input, shape index: {}]   ;;  %s1631_s2 = inlined_call_operand.vmem [shape: bf16[256,256], index: 2, kind: input, shape index: {}]   ;;  %s1632_s3 = inlined_call_operand.vmem [shape: bf16[256,256], index: 3, kind: input, shape index: {}]   ;;  %s1633_s4 = inlined_call_operand.vmem [shape: f32[1,256], index: 4, kind: input, shape index: {}]   ;;  %s1634_s5 = inlined_call_operand.hbm [shape: f32[8,256], index: 5, kind: output, shape index: {}]  }
   0x1   :  { %1638 = sst [smem:[#allocation11_spill]] %s1630_s1 }
   0x2   :  { %1639 = sst [smem:[#allocation12_spill]] %s1631_s2 }
   0x3   :  { %1640 = sst [smem:[#allocation13_spill]] %s1632_s3 }
   0x4   :  { %10 = vsyncpa [#allocation7], 0 }
   0x5   :  { %12 = vsyncpa [#allocation7 + $0x1], 0  ;;  %s1310_s18 = smov 0   ;;  %s1312_s19 = smov 0  }
   0x6   :  { %s1314_s20 = smov 0   ;;  %s1316_s21 = smov 0  }
   0x7   :  { %s1318_s22 = smov 0   ;;  %s1320_s23 = smov 0  }
   0x8   :  { %s1322_s24 = smov 0   ;;  %s1324_s25 = smov 0  }
   0x9   :  { %s1326_s26 = smov 0   ;;  %s1328_s27 = smov 0  }
   0xa LB: > { %s1007_s28 = sadd.s32 4294967295, %s1275_s27   ;;  %s1008_s29 = sadd.s32 4294967294, %s1275_s27   ;;  %s1275_s27 = sphi %s1328_s27, %s18_s27   ;;  %s1271_s26 = sphi %s1326_s26, %s1660_s26   ;;  %s1267_s25 = sphi %s1324_s25, %s1659_s25   ;;  %s1263_s24 = sphi %s1322_s24, %s1658_s24   ;;  %s1259_s23 = sphi %s1320_s23, %s1657_s23   ;;  %s1255_s22 = sphi %s1318_s22, %s1656_s22   ;;  %s1251_s21 = sphi %s1316_s21, %s1655_s21   ;;  %s1247_s20 = sphi %s1314_s20, %s1654_s20   ;;  %s1243_s19 = sphi %s1312_s19, %s1653_s19   ;;  %s1239_s18 = sphi %s1310_s18, %s1652_s18  }
   0xb   : > { %s30_s30 = sadd.s32 1, %s1267_s25  ;;  %s33_s6 = sadd.s32 1, %s1271_s26 }
   0xc   : > { %p31_p0 = scmp.ge.s32.totalorder %s30_s30, 2  ;;  %s74_s7 = sadd.s32 1, %s1255_s22 }
   0xd   : > { %p81_p1 = scmp.ne.s32.totalorder %s1255_s22, %s1251_s21  ;;  %p82_p2 = scmp.eq.s32.totalorder %s1275_s27, 0 }
   0xe   : > { %s1662_s30 = smov (%p31_p0, %s30_s30), 0  ;;  %s1664_s6 = smov (!%p31_p0, %s33_s6), %s1271_s26 }
   0xf   : > { %1641 = sst [smem:[#allocation9_spill]] %s1662_s30  ;;  %s69_s8 = ssub.s32 %s1267_s25, %s1662_s30 }
  0x10   : > { %p1373_p3 = por %p82_p2, %p81_p1  ;;  %p35_p4 = scmp.ge.s32.totalorder %s1664_s6, 2 }
  0x11   : > { %s184_s10 = sadd.s32 1, %s1247_s20  ;;  %p194_p5 = scmp.ne.s32.totalorder %s1247_s20, %s1243_s19 }
  0x12   : > { %p195_p6 = scmp.eq.s32.totalorder %s1007_s28, 3  ;;  %s1666_s6 = smov (%p35_p4, %s1664_s6), 0 }
  0x13   : > { %1643 = sst [smem:[#allocation10_spill]] %s1666_s6  ;;  %p200_p8 = scmp.ne.s32.totalorder %s1243_s19, %s1239_s18 }
  0x14   : > { %p1382_p7 = por %p195_p6, %p194_p5  ;;  %s70_s12 = ssub.s32 %s1271_s26, %s1666_s6 }
  0x15   : > { %p201_p9 = scmp.eq.s32.totalorder %s1008_s29, 3  ;;  %s71_s13 = sor.u32 %s70_s12, %s69_s8 }
  0x16   : > { %p182_p10 = scmp.eq.s32.totalorder %s70_s12, 0  ;;  %p72_p11 = scmp.eq.s32.totalorder %s71_s13, 0 }
  0x17   : > { %p1390_p12 = por %p201_p9, %p200_p8  ;;  %p1010_p13 = scmp.ge.s32.totalorder %s1275_s27, 4 }
  0x18   : > { %s1395_s15 = scalar_select %p182_p10, %s1247_s20, %s184_s10  }
  0x19   : > { %s1398_s16 = scalar_select %p72_p11, %s1255_s22, %s74_s7  }
  0x1a   : > { %217 = sbr.rel (%p1010_p13) target bundleno = 93 (0x5d), region = 16 }
  0x21   : > { %231 = sbr.rel (!%p1373_p3) target bundleno = 53 (0x35), region = 24  ;;  %s233_s17 = sand.u32 (%p1373_p3), 1, %s1255_s22  }
  0x22   : > { %s1044_s28 = sshll.u32 (%p1373_p3), %s1267_s25, 5  ;;  %s1011_s29 = sshll.u32 (%p1373_p3), %s233_s17, 6 }
  0x23   : > { %s238_s8 = sadd.s32 (%p1373_p3), %s1271_s26, %s1044_s28  ;;  %s1646_s1 = sld [smem:[#allocation11_spill]] (%p1373_p3) }
  0x24   : > { %s1014_s12 = sshll.u32 (%p1373_p3), %s238_s8, 2  ;;  %s235_s7 = scalar_lea.vmem (%p1373_p3), [#allocation3], %s1011_s29 }
  0x29   : > { %s1409_s10 = scalar_lea.vmem %s1646_s1, %s1014_s12 }
  0x2a   : > { %v256_v0 = vld [vmem:[%s1409_s10] sm:$0xf]  ;;  %v258_v1 = vld [vmem:[%s1409_s10 + $0x8] sm:$0xf]  ;;  %v260_v2 = vld [vmem:[%s1409_s10 + $0x10] sm:$0xf] }
  0x2b   : > { %257 = vst [vmem:[%s235_s7] sm:$0xf] %v256_v0  ;;  %259 = vst [vmem:[%s235_s7 + $0x4] sm:$0xf] %v258_v1  ;;  %v262_v3 = vld [vmem:[%s1409_s10 + $0x18] sm:$0xf] }
  0x2c   : > { %261 = vst [vmem:[%s235_s7 + $0x8] sm:$0xf] %v260_v2  ;;  %v264_v4 = vld [vmem:[%s1409_s10 + $0x20] sm:$0xf]  ;;  %v266_v5 = vld [vmem:[%s1409_s10 + $0x28] sm:$0xf] }
  0x2d   : > { %263 = vst [vmem:[%s235_s7 + $0xc] sm:$0xf] %v262_v3  ;;  %265 = vst [vmem:[%s235_s7 + $0x10] sm:$0xf] %v264_v4  ;;  %v268_v6 = vld [vmem:[%s1409_s10 + $0x30] sm:$0xf] }
  0x2e   : > { %267 = vst [vmem:[%s235_s7 + $0x14] sm:$0xf] %v266_v5  ;;  %v270_v7 = vld [vmem:[%s1409_s10 + $0x38] sm:$0xf]  ;;  %v272_v8 = vld [vmem:[%s1409_s10 + $0x40] sm:$0xf] }
  0x2f   : > { %269 = vst [vmem:[%s235_s7 + $0x18] sm:$0xf] %v268_v6  ;;  %271 = vst [vmem:[%s235_s7 + $0x1c] sm:$0xf] %v270_v7  ;;  %v274_v9 = vld [vmem:[%s1409_s10 + $0x48] sm:$0xf] }
  0x30   : > { %273 = vst [vmem:[%s235_s7 + $0x20] sm:$0xf] %v272_v8  ;;  %v276_v10 = vld [vmem:[%s1409_s10 + $0x50] sm:$0xf]  ;;  %v278_v11 = vld [vmem:[%s1409_s10 + $0x58] sm:$0xf] }
  0x31   : > { %275 = vst [vmem:[%s235_s7 + $0x24] sm:$0xf] %v274_v9  ;;  %277 = vst [vmem:[%s235_s7 + $0x28] sm:$0xf] %v276_v10  ;;  %v280_v12 = vld [vmem:[%s1409_s10 + $0x60] sm:$0xf] }
  0x32   : > { %279 = vst [vmem:[%s235_s7 + $0x2c] sm:$0xf] %v278_v11  ;;  %v282_v13 = vld [vmem:[%s1409_s10 + $0x68] sm:$0xf]  ;;  %v284_v14 = vld [vmem:[%s1409_s10 + $0x70] sm:$0xf] }
  0x33   : > { %281 = vst [vmem:[%s235_s7 + $0x30] sm:$0xf] %v280_v12  ;;  %283 = vst [vmem:[%s235_s7 + $0x34] sm:$0xf] %v282_v13  ;;  %v286_v15 = vld [vmem:[%s1409_s10 + $0x78] sm:$0xf] }
  0x34   : > { %285 = vst [vmem:[%s235_s7 + $0x38] sm:$0xf] %v284_v14  ;;  %287 = vst [vmem:[%s235_s7 + $0x3c] sm:$0xf] %v286_v15 }
  0x35 PF: > { %342 = sbr.rel (!%p1373_p3) target bundleno = 73 (0x49), region = 65  ;;  %s344_s6 = sand.u32 (%p1373_p3), 1, %s1255_s22  }
  0x36   : > { %s1045_s17 = sshll.u32 (%p1373_p3), %s1267_s25, 5  ;;  %s1015_s28 = sshll.u32 (%p1373_p3), %s344_s6, 6 }
  0x37   : > { %s349_s29 = sadd.s32 (%p1373_p3), %s1271_s26, %s1045_s17  ;;  %s1647_s2 = sld [smem:[#allocation12_spill]] (%p1373_p3) }
  0x38   : > { %s1018_s8 = sshll.u32 (%p1373_p3), %s349_s29, 2  ;;  %s346_s10 = scalar_lea.vmem (%p1373_p3), [#allocation4], %s1015_s28 }
  0x3d   : > { %s1435_s1 = scalar_lea.vmem %s1647_s2, %s1018_s8 }
  0x3e   : > { %v367_v16 = vld [vmem:[%s1435_s1] sm:$0xf]  ;;  %v369_v17 = vld [vmem:[%s1435_s1 + $0x8] sm:$0xf]  ;;  %v371_v18 = vld [vmem:[%s1435_s1 + $0x10] sm:$0xf] }
  0x3f   : > { %368 = vst [vmem:[%s346_s10] sm:$0xf] %v367_v16  ;;  %370 = vst [vmem:[%s346_s10 + $0x4] sm:$0xf] %v369_v17  ;;  %v373_v19 = vld [vmem:[%s1435_s1 + $0x18] sm:$0xf] }
  0x40   : > { %372 = vst [vmem:[%s346_s10 + $0x8] sm:$0xf] %v371_v18  ;;  %v375_v20 = vld [vmem:[%s1435_s1 + $0x20] sm:$0xf]  ;;  %v377_v21 = vld [vmem:[%s1435_s1 + $0x28] sm:$0xf] }
  0x41   : > { %374 = vst [vmem:[%s346_s10 + $0xc] sm:$0xf] %v373_v19  ;;  %376 = vst [vmem:[%s346_s10 + $0x10] sm:$0xf] %v375_v20  ;;  %v379_v22 = vld [vmem:[%s1435_s1 + $0x30] sm:$0xf] }
  0x42   : > { %378 = vst [vmem:[%s346_s10 + $0x14] sm:$0xf] %v377_v21  ;;  %v381_v23 = vld [vmem:[%s1435_s1 + $0x38] sm:$0xf]  ;;  %v383_v24 = vld [vmem:[%s1435_s1 + $0x40] sm:$0xf] }
  0x43   : > { %380 = vst [vmem:[%s346_s10 + $0x18] sm:$0xf] %v379_v22  ;;  %382 = vst [vmem:[%s346_s10 + $0x1c] sm:$0xf] %v381_v23  ;;  %v385_v25 = vld [vmem:[%s1435_s1 + $0x48] sm:$0xf] }
  0x44   : > { %384 = vst [vmem:[%s346_s10 + $0x20] sm:$0xf] %v383_v24  ;;  %v387_v26 = vld [vmem:[%s1435_s1 + $0x50] sm:$0xf]  ;;  %v389_v27 = vld [vmem:[%s1435_s1 + $0x58] sm:$0xf] }
  0x45   : > { %386 = vst [vmem:[%s346_s10 + $0x24] sm:$0xf] %v385_v25  ;;  %388 = vst [vmem:[%s346_s10 + $0x28] sm:$0xf] %v387_v26  ;;  %v391_v28 = vld [vmem:[%s1435_s1 + $0x60] sm:$0xf] }
  0x46   : > { %390 = vst [vmem:[%s346_s10 + $0x2c] sm:$0xf] %v389_v27  ;;  %v393_v29 = vld [vmem:[%s1435_s1 + $0x68] sm:$0xf]  ;;  %v395_v30 = vld [vmem:[%s1435_s1 + $0x70] sm:$0xf] }
  0x47   : > { %392 = vst [vmem:[%s346_s10 + $0x30] sm:$0xf] %v391_v28  ;;  %394 = vst [vmem:[%s346_s10 + $0x34] sm:$0xf] %v393_v29  ;;  %v397_v31 = vld [vmem:[%s1435_s1 + $0x78] sm:$0xf] }
  0x48   : > { %396 = vst [vmem:[%s346_s10 + $0x38] sm:$0xf] %v395_v30  ;;  %398 = vst [vmem:[%s346_s10 + $0x3c] sm:$0xf] %v397_v31 }
  0x49 PF: > { %453 = sbr.rel (!%p1373_p3) target bundleno = 93 (0x5d), region = 106  ;;  %s455_s7 = sand.u32 (%p1373_p3), 1, %s1255_s22  }
  0x4a   : > { %s1046_s6 = sshll.u32 (%p1373_p3), %s1267_s25, 5  ;;  %s1019_s17 = sshll.u32 (%p1373_p3), %s455_s7, 6 }
  0x4b   : > { %s460_s28 = sadd.s32 (%p1373_p3), %s1271_s26, %s1046_s6  ;;  %s1648_s3 = sld [smem:[#allocation13_spill]] (%p1373_p3) }
  0x4c   : > { %s1022_s29 = sshll.u32 (%p1373_p3), %s460_s28, 2  ;;  %s457_s1 = scalar_lea.vmem (%p1373_p3), [#allocation5], %s1019_s17 }
  0x51   : > { %s1461_s13 = scalar_lea.vmem %s1648_s3, %s1022_s29 }
  0x52   : > { %v478_v32 = vld [vmem:[%s1461_s13] sm:$0xf]  ;;  %v480_v33 = vld [vmem:[%s1461_s13 + $0x8] sm:$0xf]  ;;  %v482_v34 = vld [vmem:[%s1461_s13 + $0x10] sm:$0xf] }
  0x53   : > { %479 = vst [vmem:[%s457_s1] sm:$0xf] %v478_v32  ;;  %481 = vst [vmem:[%s457_s1 + $0x4] sm:$0xf] %v480_v33  ;;  %v484_v35 = vld [vmem:[%s1461_s13 + $0x18] sm:$0xf] }
  0x54   : > { %483 = vst [vmem:[%s457_s1 + $0x8] sm:$0xf] %v482_v34  ;;  %v486_v36 = vld [vmem:[%s1461_s13 + $0x20] sm:$0xf]  ;;  %v488_v37 = vld [vmem:[%s1461_s13 + $0x28] sm:$0xf] }
  0x55   : > { %485 = vst [vmem:[%s457_s1 + $0xc] sm:$0xf] %v484_v35  ;;  %487 = vst [vmem:[%s457_s1 + $0x10] sm:$0xf] %v486_v36  ;;  %v490_v38 = vld [vmem:[%s1461_s13 + $0x30] sm:$0xf] }
  0x56   : > { %489 = vst [vmem:[%s457_s1 + $0x14] sm:$0xf] %v488_v37  ;;  %v492_v39 = vld [vmem:[%s1461_s13 + $0x38] sm:$0xf]  ;;  %v494_v40 = vld [vmem:[%s1461_s13 + $0x40] sm:$0xf] }
  0x57   : > { %491 = vst [vmem:[%s457_s1 + $0x18] sm:$0xf] %v490_v38  ;;  %493 = vst [vmem:[%s457_s1 + $0x1c] sm:$0xf] %v492_v39  ;;  %v496_v41 = vld [vmem:[%s1461_s13 + $0x48] sm:$0xf] }
  0x58   : > { %495 = vst [vmem:[%s457_s1 + $0x20] sm:$0xf] %v494_v40  ;;  %v498_v42 = vld [vmem:[%s1461_s13 + $0x50] sm:$0xf]  ;;  %v500_v43 = vld [vmem:[%s1461_s13 + $0x58] sm:$0xf] }
  0x59   : > { %497 = vst [vmem:[%s457_s1 + $0x24] sm:$0xf] %v496_v41  ;;  %499 = vst [vmem:[%s457_s1 + $0x28] sm:$0xf] %v498_v42  ;;  %v502_v44 = vld [vmem:[%s1461_s13 + $0x60] sm:$0xf] }
  0x5a   : > { %501 = vst [vmem:[%s457_s1 + $0x2c] sm:$0xf] %v500_v43  ;;  %v504_v45 = vld [vmem:[%s1461_s13 + $0x68] sm:$0xf]  ;;  %v506_v46 = vld [vmem:[%s1461_s13 + $0x70] sm:$0xf] }
  0x5b   : > { %503 = vst [vmem:[%s457_s1 + $0x30] sm:$0xf] %v502_v44  ;;  %505 = vst [vmem:[%s457_s1 + $0x34] sm:$0xf] %v504_v45  ;;  %v508_v47 = vld [vmem:[%s1461_s13 + $0x78] sm:$0xf] }
  0x5c   : > { %507 = vst [vmem:[%s457_s1 + $0x38] sm:$0xf] %v506_v46  ;;  %509 = vst [vmem:[%s457_s1 + $0x3c] sm:$0xf] %v508_v47 }
  0x5d PF: > { %p1023_p0 = scmp.ge.s32.totalorder %s1275_s27, 1  ;;  %p569_p1 = scmp.lt.s32.totalorder %s1275_s27, 5 }
  0x5f   : > { %p570_p2 = pnand %p1023_p0, %p569_p1 }
  0x60   : > { %s576_s9 = sand.u32 (!%p570_p2), 1, %s1251_s21   ;;  %s1636_s10 = sand.u32 (!%p570_p2), 1, %s1243_s19  }
  0x61   : > { %573 = sbr.rel (%p570_p2) target bundleno = 401 (0x191), region = 151  ;;  %s1024_s7 = sshll.u32 (!%p570_p2), %s576_s9, 6 }
  0x62   : > { %s1485_s6 = sshll.u32 (!%p570_p2), %s1636_s10, 3  ;;  %p638_p3 = scmp.lt.s32.totalorder (!%p570_p2), %s1259_s23, 1 }
  0x63   : > { %p647_p4 = scmp.lt.s32.totalorder (!%p570_p2), %s1263_s24, 1  ;;  %s1499_s3 = scalar_lea.vmem (!%p570_p2), [#allocation3], %s1024_s7 }
  0x64   : > { %s1501_s9 = scalar_lea.vmem (!%p570_p2), [#allocation4], %s1024_s7  ;;  %s1503_s10 = scalar_lea.vmem (!%p570_p2), [#allocation5], %s1024_s7 }
  0x65   : > { %s635_s30 = scalar_lea.vmem (!%p570_p2), [#allocation6], %s1485_s6  ;;  %p1029_p5 = scmp.ne.s32.totalorder (!%p570_p2), %s1259_s23, 0 }
  0x68   : > { %s639_s17 = scalar_select %p638_p3, %s1259_s23, 1 }
  0x69   : > { %s648_s28 = scalar_select %p647_p4, %s1263_s24, 1 }
  0x6a   : > { %s1028_s29 = sshll.u32 %s639_s17, 2  ;;  %654 = sbr.rel (%p1029_p5) target bundleno = 113 (0x71), region = 167 }
  0x6b   : > { %s1494_s13 = scalar_lea.vmem %s1629_s0, %s1028_s29  ;;  %s649_s21 = scalar_lea.vmem %s1633_s4, %s648_s28 }
  0x6c   : > { %v1030_v48 = vld [vmem:[%s649_s21] ss:$0 sm:$0xff] (!%p1029_p5) }
  0x6d   : > { %662 = vst [vmem:[#allocation2] sm:$0xff] (!%p1029_p5), %v1030_v48 }
  0x71 PF: > { %v663_v49 = vld [vmem:[%s1499_s3] sm:$0xf]  ;;  %v1277_v50 = vmov 0.0   ;;  %v680_v52 = vld [vmem:[%s1501_s9 + $0x4] sm:$0xf]  ;;  %vm1278_vm0 = vmmov 0  }
  0x72   : > { %1056 = vmatprep.subr.bf16.mxu0 %v1277_v50  ;;  %v679_v51 = vld [vmem:[%s1501_s9] sm:$0xf]  ;;  %1072 = vmatprep.mubr.msk.bf16.mxu0 %vm1278_vm0, %v1277_v50  ;;  %v664_v54 = vld [vmem:[%s1499_s3 + $0x4] sm:$0xf]  ;;  %v665_v57 = vld [vmem:[%s1499_s3 + $0x8] sm:$0xf] }
  0x73   : > { %v695_v53 = vld [vmem:[%s1503_s10] sm:$0xf]  ;;  %v696_v55 = vld [vmem:[%s1503_s10 + $0x4] sm:$0xf]  ;;  %v681_v59 = vld [vmem:[%s1501_s9 + $0x8] sm:$0xf] }
  0x74   : > { %v711_v56 = vmul.bf16 %v695_v53, %v679_v51  ;;  %v712_v58 = vmul.bf16 %v696_v55, %v680_v52  ;;  %v682_v60 = vld [vmem:[%s1501_s9 + $0xc] sm:$0xf]  ;;  %v697_v61 = vld [vmem:[%s1503_s10 + $0x8] sm:$0xf]  ;;  %v667_v2 = vld [vmem:[%s1499_s3 + $0x10] sm:$0xf] }
  0x75   : > { %v666_v63 = vld [vmem:[%s1499_s3 + $0xc] sm:$0xf]  ;;  %v713_v1 = vmul.bf16 %v697_v61, %v681_v59  ;;  %v683_v5 = vld [vmem:[%s1501_s9 + $0x10] sm:$0xf]  ;;  %v684_v6 = vld [vmem:[%s1501_s9 + $0x14] sm:$0xf] }
  0x76   : > { %v727_v62 = vadd.bf16 %v711_v56, %v663_v49  ;;  %v698_v0 = vld [vmem:[%s1503_s10 + $0xc] sm:$0xf]  ;;  %v728_v3 = vadd.bf16 %v712_v58, %v664_v54  ;;  %v699_v7 = vld [vmem:[%s1503_s10 + $0x10] sm:$0xf]  ;;  %v668_v9 = vld [vmem:[%s1499_s3 + $0x14] sm:$0xf] }
  0x77   : > { %v714_v4 = vmul.bf16 %v698_v0, %v682_v60  ;;  %v729_v8 = vadd.bf16 %v713_v1, %v665_v57  ;;  %v700_v10 = vld [vmem:[%s1503_s10 + $0x14] sm:$0xf]  ;;  %v715_v11 = vmul.bf16 %v699_v7, %v683_v5  ;;  %v685_v15 = vld [vmem:[%s1501_s9 + $0x18] sm:$0xf]  ;;  %v686_v16 = vld [vmem:[%s1501_s9 + $0x1c] sm:$0xf] }
  0x78   : > { %v1031_v12 = vcombine.low %v727_v62, %v728_v3  ;;  %v716_v14 = vmul.bf16 %v700_v10, %v684_v6  ;;  %v701_v17 = vld [vmem:[%s1503_s10 + $0x18] sm:$0xf]  ;;  %v702_v19 = vld [vmem:[%s1503_s10 + $0x1c] sm:$0xf]  ;;  %v687_v25 = vld [vmem:[%s1501_s9 + $0x20] sm:$0xf] }
  0x79   : > { %v730_v13 = vadd.bf16 %v714_v4, %v666_v63  ;;  %v731_v18 = vadd.bf16 %v715_v11, %v667_v2  ;;  %v669_v22 = vld [vmem:[%s1499_s3 + $0x18] sm:$0xf]  ;;  %v717_v23 = vmul.bf16 %v701_v17, %v685_v15  ;;  %v718_v24 = vmul.bf16 %v702_v19, %v686_v16  ;;  %v703_v26 = vld [vmem:[%s1503_s10 + $0x20] sm:$0xf]  ;;  %v670_v27 = vld [vmem:[%s1499_s3 + $0x1c] sm:$0xf] }
  0x7a   : > { %1057 = vmatpush3.bf16.msra.mxu0 %v1031_v12  ;;  %v732_v21 = vadd.bf16 %v716_v14, %v668_v9  ;;  %v688_v28 = vld [vmem:[%s1501_s9 + $0x24] sm:$0xf]  ;;  %v719_v30 = vmul.bf16 %v703_v26, %v687_v25  ;;  %v671_v34 = vld [vmem:[%s1499_s3 + $0x20] sm:$0xf]  ;;  %v689_v37 = vld [vmem:[%s1501_s9 + $0x28] sm:$0xf] }
  0x7b   : > { %v1032_v20 = vcombine.low %v729_v8, %v730_v13  ;;  %1058 = vmatprep.subr.bf16.mxu0 %v1277_v50  ;;  %v704_v29 = vld [vmem:[%s1503_s10 + $0x24] sm:$0xf]  ;;  %v733_v32 = vadd.bf16 %v717_v23, %v669_v22  ;;  %v734_v33 = vadd.bf16 %v718_v24, %v670_v27  ;;  %v690_v38 = vld [vmem:[%s1501_s9 + $0x2c] sm:$0xf]  ;;  %v705_v39 = vld [vmem:[%s1503_s10 + $0x28] sm:$0xf] }
  0x7c   : > { %v1033_v31 = vcombine.low %v731_v18, %v732_v21  ;;  %v672_v35 = vld [vmem:[%s1499_s3 + $0x24] sm:$0xf]  ;;  %v720_v36 = vmul.bf16 %v704_v29, %v688_v28  ;;  %v706_v40 = vld [vmem:[%s1503_s10 + $0x2c] sm:$0xf]  ;;  %v735_v41 = vadd.bf16 %v719_v30, %v671_v34  ;;  %v673_v44 = vld [vmem:[%s1499_s3 + $0x28] sm:$0xf]  ;;  %v721_v45 = vmul.bf16 %v705_v39, %v689_v37 }
  0x7d   : > { %v1034_v42 = vcombine.low %v733_v32, %v734_v33  ;;  %v722_v46 = vmul.bf16 %v706_v40, %v690_v38  ;;  %v691_v47 = vld [vmem:[%s1501_s9 + $0x30] sm:$0xf]  ;;  %v674_v49 = vld [vmem:[%s1499_s3 + $0x2c] sm:$0xf]  ;;  %v692_v51 = vld [vmem:[%s1501_s9 + $0x34] sm:$0xf] }
  0x7e   : > { %1059 = vmatpush3.bf16.msra.mxu0 %v1032_v20  ;;  %v736_v43 = vadd.bf16 %v720_v36, %v672_v35  ;;  %v707_v48 = vld [vmem:[%s1503_s10 + $0x30] sm:$0xf]  ;;  %v708_v52 = vld [vmem:[%s1503_s10 + $0x34] sm:$0xf]  ;;  %v737_v55 = vadd.bf16 %v721_v45, %v673_v44  ;;  %v693_v60 = vld [vmem:[%s1501_s9 + $0x38] sm:$0xf] }
  0x7f   : > { %1060 = vmatprep.subr.bf16.mxu0 %v1277_v50  ;;  %v723_v53 = vmul.bf16 %v707_v48, %v691_v47  ;;  %v738_v56 = vadd.bf16 %v722_v46, %v674_v49  ;;  %v675_v57 = vld [vmem:[%s1499_s3 + $0x30] sm:$0xf]  ;;  %v676_v58 = vld [vmem:[%s1499_s3 + $0x34] sm:$0xf]  ;;  %v724_v59 = vmul.bf16 %v708_v52, %v692_v51  ;;  %v694_v61 = vld [vmem:[%s1501_s9 + $0x3c] sm:$0xf] }
  0x80   : > { %v1035_v54 = vcombine.low %v735_v41, %v736_v43  ;;  %v709_v62 = vld [vmem:[%s1503_s10 + $0x38] sm:$0xf]  ;;  %v710_v63 = vld [vmem:[%s1503_s10 + $0x3c] sm:$0xf]  ;;  %p1039_p6 = scmp.ne.s32.totalorder %s1259_s23, 1 }
  0x81   : > { %v739_v0 = vadd.bf16 %v723_v53, %v675_v57  ;;  %v1036_v1 = vcombine.low %v737_v55, %v738_v56  ;;  %v740_v2 = vadd.bf16 %v724_v59, %v676_v58  ;;  %v725_v3 = vmul.bf16 %v709_v62, %v693_v60  ;;  %v677_v5 = vld [vmem:[%s1499_s3 + $0x38] sm:$0xf]  ;;  %v678_v6 = vld [vmem:[%s1499_s3 + $0x3c] sm:$0xf] }
  0x82   : > { %1061 = vmatpush3.bf16.msra.mxu0 %v1033_v31  ;;  %v726_v4 = vmul.bf16 %v710_v63, %v694_v61  ;;  %v744_v11 = vld [vmem:[%s1494_s13] sm:$0xf] }
  0x83   : > { %1062 = vmatprep.subr.bf16.mxu0 %v1277_v50  ;;  %v1037_v7 = vcombine.low %v739_v0, %v740_v2  ;;  %v741_v8 = vadd.bf16 %v725_v3, %v677_v5  ;;  %v743_v12 = vld [vmem:[#allocation2] sm:$0xff] }
  0x84   : > { %v742_v9 = vadd.bf16 %v726_v4, %v678_v6 }
  0x86   : > { %1063 = vmatpush3.bf16.msra.mxu0 %v1034_v42  ;;  %v1038_v10 = vcombine.low %v741_v8, %v742_v9 }
  0x87   : > { %1064 = vmatprep.subr.bf16.mxu0 %v1277_v50 }
  0x8a   : > { %1065 = vmatpush3.bf16.msra.mxu0 %v1035_v54 }
  0x8b   : > { %1066 = vmatprep.subr.bf16.mxu0 %v1277_v50 }
  0x8e   : > { %1067 = vmatpush3.bf16.msra.mxu0 %v1036_v1 }
  0x8f   : > { %1068 = vmatprep.subr.bf16.mxu0 %v1277_v50 }
  0x92   : > { %1069 = vmatpush3.bf16.msra.mxu0 %v1037_v7 }
  0x93   : > { %1070 = vmatprep.subr.bf16.mxu0 %v1277_v50 }
  0x96   : > { %1071 = vmatpush3.bf16.msra.mxu0 %v1038_v10 }
  0x99   : > { %1073 = vmatmul.mubr.bf16.vlgmr.msra.gmra.mrb[0].mxu0 %v744_v11 }
 0x169   : > { %838 = sbr.rel (%p1039_p6) target bundleno = 376 (0x178), region = 171 }
 0x16c   : > { %v827_v13 = vpop.f32.mrb[0].mxu0 }
 0x16d   : > { %v833_v14 = vadd.f32 %v827_v13, %v743_v12  ;;  %v1074_v15 = vpop.f32.mrb[1].mxu0 }
 0x16e   : > { %v830_v16 = vpop.f32.mrb[2].mxu0 }
 0x16f   : > { %834 = vst [vmem:[#allocation2] sm:$0xff] %v833_v14  ;;  %v1075_v17 = vpop.f32.mrb[3].mxu0 }
 0x176   : > { %v839_v18 = vld [vmem:[#allocation2] sm:$0xff] }
 0x177   : > { %840 = vst [vmem:[%s635_s30] sm:$0xff] %v839_v18 }
 0x178 PF: > { %s1041_s2 = sshll.u32 %s1263_s24, 7  ;;  %s857_s17 = sshll.u32 %s635_s30, 4  ;;  %s858_s17 = int_to_ptr.vmem [resolvable:$true] %s857_s17 }
 0x179   : > { %s1572_s7 = scalar_lea.hbm %s1634_s5, %s1041_s2  ;;  %s1649_s23 = sand.u32 1, %s1243_s19  }
 0x17a   : > { %s842_s28 = scalar_lea.sflag [#allocation7], %s1649_s23  ;;  %s1165_s29 = scalar_lea.vmem %s858_s17, 128 }
 0x17b   : > { %p1166_p8 = scmp.ne.s32.totalorder %s858_s17, %s1165_s29  ;;  %s1279_s8 = smov [#allocation6]  }
 0x17c   : > { %s1169_s12 = sshll.u32 %s1279_s8, 4  ;;  %s1170_s12 = int_to_ptr.vmem [resolvable:$false] %s1169_s12 }
 0x17d   : > { %p1167_p9 = pnand %p1166_p8, %p1382_p7  ;;  %s1171_s13 = scalar_lea.vmem %s1170_s12, 256 }
 0x17e   : > { %p1172_p11 = scmp.lt.s32.totalorder %s858_s17, %s1170_s12  ;;  %p1173_p13 = scmp.lt.s32.totalorder %s1171_s13, %s1165_s29 }
 0x17f   : > { %p1168_p10 = pneg %p1167_p9 }
 0x180   : > { %p1174_p0 = por %p1173_p13, %p1172_p11 }
 0x182   : > { %p1175_p1 = pnand %p1174_p0, %p1168_p10 }
 0x184   : > { %1178 = shalt.err (!%p1175_p1)
}
 0x185   : > { %s1179_s24 = scalar_lea.hbm %s1572_s7, 128  ;;  %s1183_s1 = scalar_lea.hbm %s1634_s5, 256 }
 0x186   : > { %p1180_p2 = scmp.ne.s32.totalorder %s1572_s7, %s1179_s24  ;;  %p1184_p5 = scmp.lt.u32.totalorder %s1572_s7, %s1634_s5 }
 0x187   : > { %p1185_p6 = scmp.lt.u32.totalorder %s1183_s1, %s1179_s24  ;;  %p1187_p9 = scmp.lt.u32.totalorder %s1179_s24, %s1572_s7 }
 0x188   : > { %p1181_p3 = pnand %p1180_p2, %p1382_p7 }
 0x189   : > { %p1186_p8 = por %p1185_p6, %p1184_p5 }
 0x18a   : > { %p1182_p4 = pneg %p1181_p3 }
 0x18b   : > { %p1188_p10 = por %p1187_p9, %p1186_p8 }
 0x18d   : > { %p1189_p11 = pnand %p1188_p10, %p1182_p4 }
 0x18f   : > { %1192 = shalt.err (!%p1189_p11)
}
 0x190   : > { %1076 = dma.vmem_to_hbm [thread:$0]  (%p1382_p7), %s858_s17, 128, %s1572_s7, %s842_s28  }
 0x191 PF: > { %p1082_p13 = scmp.ge.s32.totalorder %s1275_s27, 2  ;;  %s869_s2 = sand.u32 1, %s1239_s18  }
 0x192   : > { %s870_s3 = scalar_lea.sflag [#allocation7], %s869_s2 }
 0x193   : > { %p1079_p0 = pnand %p1082_p13, %p1390_p12 }
 0x195   : > { %1234 = dma.done.wait (!%p1079_p0), %s870_s3, 128  }
 0x196   : > { %1236 = vsyncadd (!%p1079_p0), %s870_s3, 4294967168  ;;  %s18_s27 = sadd.s32 1, %s1275_s27   ;;  %s1650_s11 = sld [smem:[#allocation9_spill]] }
 0x197   : > { %p15_p1 = scmp.ge.s32.totalorder %s18_s27, 6   ;;  %s1651_s10 = sld [smem:[#allocation10_spill]] }
 0x198   : > { %s1652_s18 = smov %s1243_s19  ;;  %s1653_s19 = smov %s1247_s20 }
 0x199   : > { %s1654_s20 = smov %s1395_s15  ;;  %s1655_s21 = smov %s1255_s22 }
 0x19a   : > { %s1656_s22 = smov %s1398_s16  ;;  %s1657_s23 = smov %s1267_s25 }
 0x19b   : > { %s1658_s24 = smov %s1271_s26  ;;  %17 = sbr.rel (!%p15_p1) target bundleno = 10 (0xa), region = 233 }
 0x19c   : > { %s1659_s25 = smov %s1650_s11 }
 0x19d   : > { %s1660_s26 = smov %s1651_s10 }
 0x1a2   :  { %875 = vsyncpa [#allocation7], 1 }
 0x1a3   :  { %877 = vsyncpa [#allocation7 + $0x1], 1 }

</bundles_post_ra>
